<compile_context>
chip_gen: v7x
topology: tpu7x:2x2x1
jax: 0.10.0
libtpu: 0.0.40
codegen_flags: <defaults>
</compile_context>

<pallas_src>
import functools

import jax
import jax.numpy as jnp
import numpy as np
from jax.experimental import pallas as pl
from jax.experimental.pallas import tpu as pltpu

LANE = 128
TARGET_BLOCK_BYTES = 2 * 1024 * 1024   # ~2 MiB blocks: ~85% of HBM roofline


def _cdiv(a, b):
    return -(-a // b)


def _q_hswish_kernel(inv_a_ref, cs_ref, x_ref, o_ref, *, n_lvs, act_func,
                     compute_dtype):
    """Elementwise Q_HSwish on one (tile_rows, 128) block.

    inv_a_ref : (1,1) SMEM f32 = (n_lvs-1) / softplus(a)   (precomputed)
    cs_ref    : (1,1) SMEM f32 = softplus(c) / (n_lvs-1)   (precomputed)
    x_ref, o_ref : (tile_rows, LANE) VMEM blocks
    n_lvs, act_func, compute_dtype : static Python values (control flow is
    static, exactly like the torch module).
    """
    x = x_ref[...].astype(compute_dtype)

    if act_func:
        # x * hardtanh(x + 3, 0, 6) / 6  (hard-swish); 1/6 folded into a multiply.
        # Python-float constants stay weakly typed -> no accidental f32 upcast
        # on the bf16 path.
        x = x * (jnp.clip(x + 3.0, 0.0, 6.0) * (1.0 / 6.0))

    if n_lvs != 0:
        inv_a_s = inv_a_ref[0, 0].astype(compute_dtype)   # (n_lvs-1)/softplus(a)
        cs = cs_ref[0, 0].astype(compute_dtype)           # softplus(c)/(n_lvs-1)
        # hardtanh((x+b)/a, 0, 1) * (n_lvs-1)  ==  clip((x+b)*(n_lvs-1)/a, 0, n_lvs-1)
        # (scale folded into the reciprocal: one fewer vmul per element).
        # b = 3/8, d = -3/8 are the module's fixed buffers (hard-coded here).
        t = jnp.clip((x + 0.375) * inv_a_s, 0.0, float(n_lvs - 1))
        # RoundQuant: round(.)/(n_lvs-1) * c  ->  round(.) * cs, then + d.
        # jnp.round == round-half-to-even, matching torch.round semantics.
        x = jnp.round(t) * cs + (-0.375)

    o_ref[...] = x.astype(o_ref.dtype)


def _choose_tiling(rows, itemsize):
    """Pick (tile_rows, grid_steps): dtype-aware sublane rounding, ~2 MiB blocks,
    and an even step count when >1 so v7x's two TensorCores split evenly."""
    sublane = max(8, 32 // max(itemsize, 1))              # 8 f32 / 16 bf16 / 32 i8
    target_rows = max(sublane, TARGET_BLOCK_BYTES // (LANE * itemsize))

    tile = min(target_rows, max(rows, sublane))
    tile = _cdiv(tile, sublane) * sublane
    steps = _cdiv(rows, tile)
    if steps > 1 and steps % 2 == 1:
        # Prefer an even grid so the "parallel" axis shards evenly across the
        # two v7x TensorCores; costs ~0.35 us extra on 1-TC parts (negligible).
        tile2 = _cdiv(_cdiv(rows, steps + 1), sublane) * sublane
        if _cdiv(rows, tile2) % 2 == 0:
            tile, steps = tile2, _cdiv(rows, tile2)
    return tile, steps


def q_hswish(x, a_param, c_param, *, n_lvs, act_func=True):
    """Pallas Q_HSwish forward. x: any-shape float array. Returns same shape/dtype."""
    orig_shape = x.shape
    orig_dtype = x.dtype
    total = int(np.prod(orig_shape))
    itemsize = jnp.dtype(orig_dtype).itemsize
    rows = max(1, _cdiv(total, LANE))
    tile_rows, grid_steps = _choose_tiling(rows, itemsize)

    x_flat = x.reshape(-1)
    lane_pad = rows * LANE - total
    if lane_pad:                       # only when total is not 128-aligned (<128 elems)
        x_flat = jnp.pad(x_flat, (0, lane_pad))
    x2d = x_flat.reshape(rows, LANE)

    # Scalar parameter transforms hoisted out of the kernel (computed once):
    # softplus(a), softplus(c), with the (n_lvs-1) scale folded in.
    a = jax.nn.softplus(a_param.astype(jnp.float32).reshape(()))
    c = jax.nn.softplus(c_param.astype(jnp.float32).reshape(()))
    denom = float(max(n_lvs - 1, 1))   # n_lvs==1 guarded (torch would div-by-zero)
    inv_a_scaled = (denom / a).reshape(1, 1)
    cs = (c / denom).reshape(1, 1)

    compute_dtype = jnp.bfloat16 if orig_dtype == jnp.bfloat16 else jnp.float32
    kernel = functools.partial(_q_hswish_kernel, n_lvs=n_lvs, act_func=act_func,
                               compute_dtype=compute_dtype)

    out2d = pl.pallas_call(
        kernel,
        out_shape=jax.ShapeDtypeStruct((rows, LANE), orig_dtype),
        grid=(grid_steps,),
        in_specs=[
            pl.BlockSpec(memory_space=pltpu.SMEM),              # (n_lvs-1)/softplus(a)
            pl.BlockSpec(memory_space=pltpu.SMEM),              # softplus(c)/(n_lvs-1)
            pl.BlockSpec((tile_rows, LANE), lambda i: (i, 0)),  # x block
        ],
        out_specs=pl.BlockSpec((tile_rows, LANE), lambda i: (i, 0)),
        compiler_params=pltpu.CompilerParams(
            dimension_semantics=("parallel",)),
    )(inv_a_scaled, cs, x2d)

    out_flat = out2d.reshape(-1)
    if lane_pad:
        out_flat = out_flat[:total]
    return out_flat.reshape(orig_shape)


def q_hswish_ref(x, a_param, c_param, *, n_lvs, act_func=True):
    """Pure-JAX f32 reference mirroring the PyTorch forward.

    Uses the same folded-scale / reciprocal-multiply formulation as the kernel
    (algebraically identical to torch's divides; <=1 ulp apart before rounding).
    """
    x = x.astype(jnp.float32)
    if act_func:
        x = x * (jnp.clip(x + 3.0, 0.0, 6.0) * (1.0 / 6.0))
    if n_lvs == 0:
        return x
    a = jax.nn.softplus(jnp.asarray(a_param, jnp.float32))
    c = jax.nn.softplus(jnp.asarray(c_param, jnp.float32))
    t = jnp.clip((x + 0.375) * ((n_lvs - 1) / a), 0.0, float(n_lvs - 1))
    return jnp.round(t) * (c / (n_lvs - 1)) - 0.375


if __name__ == "__main__":
    key = jax.random.PRNGKey(0)
    x = jax.random.normal(key, (2, 4, 16, 16), dtype=jnp.float32) * 3.0

    # Deterministic parameter init, mimicking Q_HSwish.initialize(n_lvs, offset, diff):
    #   a = c = log(exp(offset + diff) - 1)
    n_lvs = 16
    offset, diff = 3.0, 0.5
    init_val = float(np.log(np.exp(offset + diff) - 1.0))
    a_param = jnp.full((1,), init_val, dtype=jnp.float32)
    c_param = jnp.full((1,), init_val, dtype=jnp.float32)

    # Quantized path (n_lvs != 0, act_func=True)
    out = jax.block_until_ready(
        q_hswish(x, a_param, c_param, n_lvs=n_lvs, act_func=True))
    ref = q_hswish_ref(x, a_param[0], c_param[0], n_lvs=n_lvs, act_func=True)
    np.testing.assert_allclose(np.asarray(out), np.asarray(ref), rtol=1e-5, atol=1e-5)

    # Pass-through quantizer path (n_lvs == 0): pure hard-swish
    out0 = jax.block_until_ready(
        q_hswish(x, a_param, c_param, n_lvs=0, act_func=True))
    ref0 = q_hswish_ref(x, a_param[0], c_param[0], n_lvs=0, act_func=True)
    np.testing.assert_allclose(np.asarray(out0), np.asarray(ref0), rtol=1e-5, atol=1e-5)

    # Ragged shape: element count not a multiple of 128 (exercises the minimal
    # lane pad plus Pallas' partial last row-block handling).
    x_odd = jax.random.normal(jax.random.PRNGKey(1), (3, 5, 7, 11),
                              dtype=jnp.float32) * 3.0
    out_odd = jax.block_until_ready(
        q_hswish(x_odd, a_param, c_param, n_lvs=n_lvs, act_func=True))
    ref_odd = q_hswish_ref(x_odd, a_param[0], c_param[0], n_lvs=n_lvs, act_func=True)
    np.testing.assert_allclose(np.asarray(out_odd), np.asarray(ref_odd),
                               rtol=1e-5, atol=1e-5)

    # bf16 path: native bf16 compute in the kernel.  Compared against the f32
    # reference with a tolerance of ~1 quantization level (bf16 rounding near a
    # level boundary may legitimately pick the adjacent level).
    x_bf16 = (jax.random.normal(jax.random.PRNGKey(2), (2, 4, 16, 16),
                                dtype=jnp.float32) * 3.0).astype(jnp.bfloat16)
    out_bf16 = jax.block_until_ready(
        q_hswish(x_bf16, a_param, c_param, n_lvs=n_lvs, act_func=True))
    ref_bf16 = q_hswish_ref(x_bf16.astype(jnp.float32), a_param[0], c_param[0],
                            n_lvs=n_lvs, act_func=True)
    quant_step = float(jax.nn.softplus(c_param[0])) / (n_lvs - 1)
    np.testing.assert_allclose(np.asarray(out_bf16, dtype=np.float32),
                               np.asarray(ref_bf16),
                               rtol=0.0, atol=quant_step + 0.06)

    print("KERNEL_OK")
</pallas_src>

<mosaic_0001>
module attributes {stable_mosaic.version = 11 : i64} {
  func.func @_q_hswish_kernel(%arg0: i32, %arg1: memref<1x1xf32, #tpu.memory_space<smem>>, %arg2: memref<1x1xf32, #tpu.memory_space<smem>>, %arg3: memref<16x128xf32, #tpu.memory_space<vmem>>, %arg4: memref<16x128xf32, #tpu.memory_space<vmem>>) attributes {dimension_semantics = [#tpu.dimension_semantics<parallel>], iteration_bounds = array<i64: 1>, scalar_prefetch = 0 : i64, scratch_operands = 0 : i64, tpu.core_type = #tpu.core_type<tc>, window_params = [{transform_indices = @transform_0, window_bounds = array<i64: 1, 1>}, {transform_indices = @transform_1, window_bounds = array<i64: 1, 1>}, {transform_indices = @transform_2, window_bounds = array<i64: 16, 128>}, {transform_indices = @transform_3, window_bounds = array<i64: 16, 128>}]} {
    %c0 = arith.constant 0 : index
    %c0_0 = arith.constant 0 : index
    %0 = vector.load %arg3[%c0, %c0_0] : memref<16x128xf32, #tpu.memory_space<vmem>>, vector<16x128xf32>
    %cst = arith.constant 3.000000e+00 : f32
    %1 = vector.broadcast %cst : f32 to vector<16x128xf32>
    %2 = arith.addf %0, %1 : vector<16x128xf32>
    %cst_1 = arith.constant 0.000000e+00 : f32
    %cst_2 = arith.constant 6.000000e+00 : f32
    %3 = vector.broadcast %cst_1 : f32 to vector<16x128xf32>
    %4 = arith.maximumf %3, %2 : vector<16x128xf32>
    %5 = vector.broadcast %cst_2 : f32 to vector<16x128xf32>
    %6 = arith.minimumf %5, %4 : vector<16x128xf32>
    %cst_3 = arith.constant 0.166666672 : f32
    %7 = vector.broadcast %cst_3 : f32 to vector<16x128xf32>
    %8 = arith.mulf %6, %7 : vector<16x128xf32>
    %9 = arith.mulf %0, %8 : vector<16x128xf32>
    %c0_4 = arith.constant 0 : index
    %c0_5 = arith.constant 0 : index
    %10 = memref.load %arg1[%c0_4, %c0_5] : memref<1x1xf32, #tpu.memory_space<smem>>
    %c0_6 = arith.constant 0 : index
    %c0_7 = arith.constant 0 : index
    %11 = memref.load %arg2[%c0_6, %c0_7] : memref<1x1xf32, #tpu.memory_space<smem>>
    %cst_8 = arith.constant 3.750000e-01 : f32
    %12 = vector.broadcast %cst_8 : f32 to vector<16x128xf32>
    %13 = arith.addf %9, %12 : vector<16x128xf32>
    %14 = vector.broadcast %10 : f32 to vector<16x128xf32>
    %15 = arith.mulf %13, %14 : vector<16x128xf32>
    %cst_9 = arith.constant 0.000000e+00 : f32
    %cst_10 = arith.constant 1.500000e+01 : f32
    %16 = vector.broadcast %cst_9 : f32 to vector<16x128xf32>
    %17 = arith.maximumf %16, %15 : vector<16x128xf32>
    %18 = vector.broadcast %cst_10 : f32 to vector<16x128xf32>
    %19 = arith.minimumf %18, %17 : vector<16x128xf32>
    %20 = math.roundeven %19 : vector<16x128xf32>
    %21 = vector.broadcast %11 : f32 to vector<16x128xf32>
    %22 = arith.mulf %20, %21 : vector<16x128xf32>
    %cst_11 = arith.constant -3.750000e-01 : f32
    %23 = vector.broadcast %cst_11 : f32 to vector<16x128xf32>
    %24 = arith.addf %22, %23 : vector<16x128xf32>
    %c0_12 = arith.constant 0 : index
    %c0_13 = arith.constant 0 : index
    %25 = vector.load %arg4[%c0_12, %c0_13] : memref<16x128xf32, #tpu.memory_space<vmem>>, vector<16x128xf32>
    tpu.vector_store %arg4[%c0_12, %c0_13], %24 {strides = array<i32>} : memref<16x128xf32, #tpu.memory_space<vmem>>, vector<16x128xf32>,
    return
  }
  func.func @transform_0(%arg0: i32) -> (i32, i32) {
    %c0_i32 = arith.constant 0 : i32
    %c0_i32_0 = arith.constant 0 : i32
    %c0_i32_1 = arith.constant 0 : i32
    return %c0_i32, %c0_i32_0 : i32, i32
  }
  func.func @transform_1(%arg0: i32) -> (i32, i32) {
    %c0_i32 = arith.constant 0 : i32
    %c0_i32_0 = arith.constant 0 : i32
    %c0_i32_1 = arith.constant 0 : i32
    return %c0_i32, %c0_i32_0 : i32, i32
  }
  func.func @transform_2(%arg0: i32) -> (i32, i32) {
    %c0_i32 = arith.constant 0 : i32
    %c0_i32_0 = arith.constant 0 : i32
    return %arg0, %c0_i32 : i32, i32
  }
  func.func @transform_3(%arg0: i32) -> (i32, i32) {
    %c0_i32 = arith.constant 0 : i32
    %c0_i32_0 = arith.constant 0 : i32
    return %arg0, %c0_i32 : i32, i32
  }
}

</mosaic_0001>

<bundles_post_ra>
// kernel: tpu_custom_call.1
= control target key start
LH: loop header
LB: loop body
LE: loop exit
PB: predicated region body
PF: predicated region fallthrough
CT: control target
= control target key end

     0   :  { %10 = vsyncpa [#allocation5], 0  ;;  %s194_s0 = inlined_call_operand.<no memory space> [shape: f32[1,1], index: 0, kind: input, shape index: {}]   ;;  %s195_s1 = inlined_call_operand.<no memory space> [shape: f32[1,1], index: 1, kind: input, shape index: {}]   ;;  %s196_s2 = inlined_call_operand.hbm [shape: f32[16,128], index: 2, kind: input, shape index: {}]   ;;  %s197_s3 = inlined_call_operand.hbm [shape: f32[16,128], index: 3, kind: output, shape index: {}]  }
   0x1   :  { %11 = vsyncpa [#allocation6], 0  ;;  %s134_s12 = smov [#allocation4]   ;;  %s86_s16 = scalar_lea.hbm %s196_s2, 256 }
   0x2   :  { %s21_s13 = sshll.u32 %s134_s12, 4  ;;  %p87_p0 = scmp.ne.s32.totalorder %s196_s2, %s86_s16  ;;  %s22_s13 = int_to_ptr.vmem [resolvable:$true] %s21_s13 }
   0x3   :  { %p90_p1 = scmp.lt.u32.totalorder %s86_s16, %s196_s2 }
   0x5   :  { %p92_p2 = pnand %p90_p1, %p87_p0 }
   0x7   :  { %95 = shalt.err (!%p92_p2)
}
   0x8   :  { %s96_s21 = scalar_lea.vmem %s22_s13, 256  ;;  %p101_p4 = scmp.lt.s32.totalorder %s22_s13, %s22_s13 }
   0x9   :  { %p97_p3 = scmp.ne.s32.totalorder %s22_s13, %s96_s21  ;;  %p102_p5 = scmp.lt.s32.totalorder %s96_s21, %s96_s21 }
   0xb   :  { %p103_p6 = por %p102_p5, %p101_p4 }
   0xd   :  { %p104_p7 = pnand %p103_p6, %p97_p3 }
   0xf   :  { %107 = shalt.err (!%p104_p7)
}
  0x10   :  { %s135_s22 = smov 128   ;;  %s136_s23 = smov 8  }
  0x11   :  { %27 = dma.hbm_to_vmem [thread:$0]  %s196_s2, 256, %s22_s13, [#allocation5], %s135_s22, %s135_s22, %s136_s23  }
  0x12   :  { %130 = dma.done.wait [#allocation5], 256  }
  0x13   :  { %131 = vsyncadd [#allocation5], 4294967040  ;;  %v31_v0 = vld [vmem:[#allocation4] sm:$0xff]  ;;  %v32_v1 = vld [vmem:[#allocation4 + $0x8] sm:$0xff]  ;;  %v47_v12 = vstv %s194_s0  ;;  %v56_v21 = vstv %s195_s1  ;;  %s137_s29 = smov [#allocation7]  }
  0x14   :  { %v33_v2 = vadd.f32 3.0, %v31_v0  ;;  %v34_v3 = vadd.f32 3.0, %v32_v1  ;;  %s68_s30 = sshll.u32 %s137_s29, 4  ;;  %s69_s30 = int_to_ptr.vmem [resolvable:$true] %s68_s30 }
  0x15   :  { %s108_s0 = scalar_lea.vmem %s69_s30, 256  ;;  %p113_p9 = scmp.lt.s32.totalorder %s69_s30, %s69_s30 }
  0x16   :  { %v35_v4 = vmax.f32 %v33_v2, 0.0  ;;  %v36_v5 = vmax.f32 %v34_v3, 0.0  ;;  %p109_p8 = scmp.ne.s32.totalorder %s69_s30, %s108_s0  ;;  %p114_p10 = scmp.lt.s32.totalorder %s108_s0, %s108_s0 }
  0x18   :  { %v37_v6 = vmin.f32 %v35_v4, 6.0  ;;  %v38_v7 = vmin.f32 %v36_v5, 6.0  ;;  %p115_p11 = por %p114_p10, %p113_p9 }
  0x1a   :  { %v39_v8 = vmul.f32 0.16666667, %v37_v6  ;;  %v40_v9 = vmul.f32 0.16666667, %v38_v7  ;;  %p116_p12 = pnand %p115_p11, %p109_p8 }
  0x1c   :  { %v41_v10 = vmul.f32 %v39_v8, %v31_v0  ;;  %v42_v11 = vmul.f32 %v40_v9, %v32_v1 }
  0x1e   :  { %v45_v13 = vadd.f32 0.375, %v41_v10  ;;  %v46_v14 = vadd.f32 0.375, %v42_v11 }
  0x20   :  { %v48_v15 = vmul.f32 %v47_v12, %v45_v13  ;;  %v49_v16 = vmul.f32 %v47_v12, %v46_v14 }
  0x22   :  { %v50_v17 = vmax.f32 %v48_v15, 0.0  ;;  %v51_v18 = vmax.f32 %v49_v16, 0.0 }
  0x24   :  { %v52_v19 = vmin.f32 %v50_v17, 15.0  ;;  %v53_v20 = vmin.f32 %v51_v18, 15.0 }
  0x26   :  { %v80_v22 = vround.rtne.f32 %v52_v19  ;;  %v81_v23 = vround.rtne.f32 %v53_v20 }
  0x28   :  { %v57_v24 = vmul.f32 %v80_v22, %v56_v21  ;;  %v58_v25 = vmul.f32 %v81_v23, %v56_v21 }
  0x2a   :  { %v59_v26 = vadd.f32 -0.375, %v57_v24  ;;  %v60_v27 = vadd.f32 -0.375, %v58_v25 }
  0x2c   :  { %61 = vst [vmem:[#allocation7] sm:$0xff] %v59_v26  ;;  %62 = vst [vmem:[#allocation7 + $0x8] sm:$0xff] %v60_v27 }
  0x2d   :  { %119 = shalt.err (!%p116_p12)
}
  0x2e   :  { %s120_s5 = scalar_lea.hbm %s197_s3, 256 }
  0x2f   :  { %p121_p13 = scmp.ne.s32.totalorder %s197_s3, %s120_s5  ;;  %p124_p0 = scmp.lt.u32.totalorder %s120_s5, %s197_s3 }
  0x31   :  { %p126_p1 = pnand %p124_p0, %p121_p13 }
  0x33   :  { %129 = shalt.err (!%p126_p1)
}
  0x34   :  { %74 = dma.vmem_to_hbm [thread:$0]  %s69_s30, 256, %s197_s3, [#allocation6], %s135_s22, %s135_s22, %s136_s23  }
  0x35   :  { %132 = dma.done.wait [#allocation6], 256  }
  0x36   :  { %133 = vsyncadd [#allocation6], 4294967040 }
  0x37   :  { %78 = vsyncpa [#allocation5], 1 }
  0x38   :  { %79 = vsyncpa [#allocation6], 1 }

</bundles_post_ra>
